<compile_context>
chip_gen: v5e
topology: v5e:2x2
jax: 0.10.0
libtpu: 0.0.40
codegen_flags: <defaults>
</compile_context>

<pallas_src>
import functools

import jax
import jax.numpy as jnp
from jax.experimental import pallas as pl
from jax.experimental.pallas import tpu as pltpu

_LANE = 128
_WIDTH_CANDIDATES = (4096, 2048, 1024, 512, 256, 128)
_FALLBACK_PHYS_VMEM = 64 << 20   # v7x physical VMEM (smallest of v5e/v6e/v7x)
_MAX_VMEM_BUDGET = 32 << 20      # scoped-VMEM limit we request explicitly


@functools.lru_cache(maxsize=None)
def _vmem_budget_bytes() -> int:
    """Generation-aware scoped-VMEM budget (<= half of physical VMEM)."""
    try:
        phys = int(pltpu.get_tpu_info().vmem_capacity_bytes)
    except Exception:  # older jax / missing attribute / non-TPU tracing
        phys = _FALLBACK_PHYS_VMEM
    return int(min(_MAX_VMEM_BUDGET, phys // 2))


def _target_block_bytes() -> int:
    # Input + output, each double-buffered -> ~4x block bytes of live VMEM;
    # budget/8 keeps that under ~half of the requested scoped-VMEM limit.
    return max(1 << 20, _vmem_budget_bytes() // 8)


def _sublane_multiple(dtype) -> int:
    """Native packed sublane rows: 8 for 32-bit, 16 for bf16, 32 for int8."""
    itemsize = jnp.dtype(dtype).itemsize
    return 8 * max(1, 4 // itemsize)


def _choose_width(n_aligned: int, packing: int) -> int:
    """Widest lane-dense width dividing n_aligned, preferring rows >= packing
    (avoids rows=1 slabs that fill 1/8th of each vreg and mask every store)."""
    for w in _WIDTH_CANDIDATES:
        if n_aligned % w == 0 and n_aligned // w >= packing:
            return w
    for w in _WIDTH_CANDIDATES:
        if n_aligned % w == 0:
            return w
    return _LANE


def _choose_block_rows(rows: int, max_rows: int, packing: int) -> int:
    """Pick block rows (a multiple of `packing`, <= max_rows).

    Preferences: (a) grid >= 2 whenever rows >= 2 minimum tiles so v7x's two
    TensorCores both get work; (b) a divisor of `rows` (full final block, no
    masked stores), with an even grid if possible; (c) otherwise the largest
    allowed size (partial, masked final block).
    """
    if rows <= packing:
        return rows                               # single full-array block
    cap = min(max_rows, rows)
    if rows >= 2 * packing:
        cap = min(cap, ((rows + 1) // 2) // packing * packing)
    cap = max(packing, (cap // packing) * packing)
    floor = max(packing, (cap // 2 // packing) * packing)
    best_div = None
    for br in range(cap, floor - 1, -packing):
        if rows % br == 0:
            if (rows // br) % 2 == 0:
                return br                         # full blocks, even grid
            if best_div is None:
                best_div = br                     # full blocks, odd grid
    return best_div if best_div is not None else cap


def _lambda_kernel(func, x_ref, o_ref):
    # Apply the user's element-wise function to the current VMEM tile.
    o_ref[...] = func(x_ref[...]).astype(o_ref.dtype)


def _apply_slab(x2d, func, out_dtype, use_alias):
    """Run `func` element-wise over a lane-aligned (rows, width) slab."""
    rows, width = x2d.shape
    in_dtype = x2d.dtype
    in_isz = jnp.dtype(in_dtype).itemsize
    out_isz = jnp.dtype(out_dtype).itemsize
    packing = max(_sublane_multiple(in_dtype), _sublane_multiple(out_dtype))

    target = _target_block_bytes()
    max_rows = max(packing, target // (width * max(in_isz, out_isz)))
    block_rows = _choose_block_rows(rows, max_rows, packing)
    grid = (pl.cdiv(rows, block_rows),)

    n = rows * width
    cost = pl.CostEstimate(
        flops=n, transcendentals=0, bytes_accessed=n * (in_isz + out_isz))

    return pl.pallas_call(
        functools.partial(_lambda_kernel, func),
        out_shape=jax.ShapeDtypeStruct((rows, width), out_dtype),
        grid_spec=pltpu.PrefetchScalarGridSpec(
            num_scalar_prefetch=0,
            grid=grid,
            in_specs=[pl.BlockSpec((block_rows, width), lambda i: (i, 0))],
            out_specs=pl.BlockSpec((block_rows, width), lambda i: (i, 0)),
        ),
        compiler_params=pltpu.CompilerParams(
            dimension_semantics=("parallel",),
            vmem_limit_bytes=_vmem_budget_bytes(),
        ),
        cost_estimate=cost,
        input_output_aliases={0: 0} if use_alias else {},
    )(x2d)


def _lambda_apply_impl(x, func, donate):
    orig_shape = x.shape
    in_dtype = x.dtype
    out_dtype = jax.eval_shape(
        func, jax.ShapeDtypeStruct(orig_shape, in_dtype)).dtype

    flat = x.reshape(-1)
    n = flat.shape[0]
    n_aligned = (n // _LANE) * _LANE
    tail = n - n_aligned

    if n_aligned == 0:
        # <128 elements: a kernel launch costs more than the work itself.
        return func(x)

    packing = max(_sublane_multiple(in_dtype), _sublane_multiple(out_dtype))
    width = _choose_width(n_aligned, packing)
    rows = n_aligned // width

    prefix = flat[:n_aligned] if tail else flat
    use_alias = bool(donate) and (out_dtype == in_dtype)
    out_flat = _apply_slab(
        prefix.reshape(rows, width), func, out_dtype, use_alias).reshape(-1)

    if tail:
        # Ragged tail (< 128 elems): no full-array jnp.pad / trailing slice;
        # compute the tiny tail directly and stitch it on.
        out_flat = jnp.concatenate([out_flat, func(flat[n_aligned:])])

    return out_flat.reshape(orig_shape)


_apply_jit = jax.jit(_lambda_apply_impl, static_argnums=(1, 2))
_apply_donating_jit = jax.jit(
    _lambda_apply_impl, static_argnums=(1, 2), donate_argnums=(0,))


def lambda_apply(x, func, *, donate=False):
    """Pallas equivalent of Lambda(func).forward(x) for element-wise `func`.

    With donate=True (and a dtype-preserving func) the input HBM buffer is
    donated and aliased to the output (halves HBM footprint); the caller must
    not use the input array afterwards.
    """
    fn = _apply_donating_jit if donate else _apply_jit
    return fn(x, func, donate)


class Lambda:
    """Mirror of the PyTorch module: applies `func` to its input."""

    def __init__(self, func):
        self.func = func

    def __call__(self, x):
        return lambda_apply(x, self.func)


if __name__ == "__main__":
    # Representative element-wise func this Lambda instance wraps (ReLU).
    func = lambda v: jnp.maximum(v, 0).astype(v.dtype)
    mod = Lambda(func)

    key = jax.random.PRNGKey(0)
    k1, k2, k3, k4 = jax.random.split(key, 4)

    # 1) Spec-like NCHW shape (small): single lane-dense block, rows >= 8.
    x1 = jax.random.normal(k1, (2, 4, 16, 16), dtype=jnp.float32)
    # 2) Larger tensor exercising the tiled grid path (2 MiB, even grid of 2).
    x2 = jax.random.normal(k2, (8, 64, 32, 32), dtype=jnp.float32)
    # 3) bf16 tensor exercising dtype-aware sublane packing (rows = 16).
    x3 = jax.random.normal(k3, (2, 8, 16, 16), dtype=jnp.bfloat16)
    # 4) Ragged size (1155 elements): aligned-prefix kernel + tiny tail path.
    x4 = jax.random.normal(k4, (3, 5, 7, 11), dtype=jnp.float32)

    for x in (x1, x2, x3, x4):
        y_ref = func(x)
        y = jax.block_until_ready(mod(x))
        assert y.shape == x.shape and y.dtype == y_ref.dtype
        assert jnp.allclose(y, y_ref), "Pallas Lambda kernel mismatch"

    # Donation path: input HBM buffer aliased to the output (dtype-preserving
    # func).  Use a private copy we are allowed to donate and never reuse it.
    x2_donor = x2 + 0.0
    y2_donated = jax.block_until_ready(lambda_apply(x2_donor, func, donate=True))
    assert jnp.allclose(y2_donated, func(x2)), "Pallas Lambda donate-path mismatch"

    print("KERNEL_OK")
</pallas_src>

<mosaic_0001>
module attributes {stable_mosaic.version = 11 : i64} {
  func.func @_lambda_kernel(%arg0: i32, %arg1: memref<8x256xf32, #tpu.memory_space<vmem>>, %arg2: memref<8x256xf32, #tpu.memory_space<vmem>>) attributes {dimension_semantics = [#tpu.dimension_semantics<parallel>], iteration_bounds = array<i64: 1>, scalar_prefetch = 0 : i64, scratch_operands = 0 : i64, tpu.core_type = #tpu.core_type<tc>, window_params = [{transform_indices = @transform_0, window_bounds = array<i64: 8, 256>}, {transform_indices = @transform_1, window_bounds = array<i64: 8, 256>}]} {
    %c0 = arith.constant 0 : index
    %c0_0 = arith.constant 0 : index
    %0 = vector.load %arg1[%c0, %c0_0] : memref<8x256xf32, #tpu.memory_space<vmem>>, vector<8x256xf32>
    %cst = arith.constant 0.000000e+00 : f32
    %1 = vector.broadcast %cst : f32 to vector<8x256xf32>
    %2 = arith.maximumf %0, %1 : vector<8x256xf32>
    %c0_1 = arith.constant 0 : index
    %c0_2 = arith.constant 0 : index
    %3 = vector.load %arg2[%c0_1, %c0_2] : memref<8x256xf32, #tpu.memory_space<vmem>>, vector<8x256xf32>
    tpu.vector_store %arg2[%c0_1, %c0_2], %2 {strides = array<i32>} : memref<8x256xf32, #tpu.memory_space<vmem>>, vector<8x256xf32>,
    return
  }
  func.func @transform_0(%arg0: i32) -> (i32, i32) {
    %c0_i32 = arith.constant 0 : i32
    %c0_i32_0 = arith.constant 0 : i32
    return %arg0, %c0_i32 : i32, i32
  }
  func.func @transform_1(%arg0: i32) -> (i32, i32) {
    %c0_i32 = arith.constant 0 : i32
    %c0_i32_0 = arith.constant 0 : i32
    return %arg0, %c0_i32 : i32, i32
  }
}

</mosaic_0001>

<bundles_post_ra>
// kernel: _lambda_apply_impl.1
= control target key start
LH: loop header
LB: loop body
LE: loop exit
PB: predicated region body
PF: predicated region fallthrough
CT: control target
= control target key end

     0   :  { %s40_s0 = inlined_call_operand.vmem [shape: f32[8,256], index: 0, kind: input, shape index: {}]   ;;  %s41_s1 = inlined_call_operand.vmem [shape: f32[8,256], index: 1, kind: output, shape index: {}]  }
   0x1   :  { %v8_v0 = vld [vmem:[%s40_s0] sm:$0xff]  ;;  %v9_v1 = vld [vmem:[%s40_s0 + $0x8] sm:$0xff] }
   0x2   :  { %v10_v2 = vmax.f32 %v8_v0, 0.0  ;;  %v11_v3 = vmax.f32 %v9_v1, 0.0 }
   0x4   :  { %12 = vst [vmem:[%s41_s1] sm:$0xff] %v10_v2 }
   0x5   :  { %13 = vst [vmem:[%s41_s1 + $0x8] sm:$0xff] %v11_v3 }

</bundles_post_ra>
